<compile_context>
chip_gen: v7x
topology: tpu7x:2x2x1
jax: 0.10.0
libtpu: 0.0.40
codegen_flags: <defaults>
</compile_context>

<pallas_src>
import jax
import jax.numpy as jnp
from jax.experimental import pallas as pl
from jax.experimental.pallas import tpu as pltpu

LANE = 128  # TPU lane width / MXU tile edge


def _round_up(x, m):
    return ((x + m - 1) // m) * m


def _per_row_vmem_bytes(Mp):
    # Rough per-batch-row VMEM: live f32 intermediates (incl. the transposed
    # hardswish tile), bf16 MXU copies, double-buffered input tiles (each
    # lane-padded to 128 lanes, assume <=f32) and the output row.
    return 5 * Mp * 4 + 2 * Mp * 2 + 2 * 2 * LANE * 4 + 8


def _weight_vmem_bytes(S, A, Mp):
    # Single-buffered resident weights (bf16) + f32 bias rows + final row/bias.
    return (S + A + 2 * Mp) * Mp * 2 + (4 * Mp + 1) * 4


def _select_tile_b(B, S, A, Mp, budget_bytes):
    """Largest 128-aligned batch tile that keeps the footprint under budget."""
    weight_bytes = _weight_vmem_bytes(S, A, Mp)
    per_row = _per_row_vmem_bytes(Mp)
    avail = max(budget_bytes - weight_bytes, per_row * LANE)
    t = (avail // per_row) // LANE * LANE
    t = max(LANE, min(2048, t))
    if B >= 2 * LANE:
        # Guarantee >=2 grid steps so the "parallel" batch axis can actually be
        # sharded across v7x's two TensorCores (no cost on v5e/v6e).
        t = min(t, _round_up((B + 1) // 2, LANE))
    return t


def _critic_kernel(s_ref, a_ref,
                   w1s_ref, w1a_ref, b1_ref,
                   w2_ref, b2_ref,
                   w3_ref, b3_ref,
                   w4_ref, b4_ref,
                   o_ref):
    """One batch tile of the Critic MLP.

    s:   [TB, S]       a:   [TB, A]        (bf16 or f32)
    w1s: [S, Mp] bf16  w1a: [A, Mp] bf16   b1: [1, Mp] f32
    w2:  [Mp, Mp] bf16                     b2: [1, Mp] f32
    w3:  [Mp, Mp] bf16                     b3: [1, Mp] f32
    w4:  [1, Mp] f32 (pre-scaled by 1/6)   b4: [1, 1]  f32
    o:   [1, TB] f32 (lane-dense row)
    """
    # bf16 matmul operands (MXU fast path); accumulation + elementwise stay f32.
    s = s_ref[...].astype(jnp.bfloat16)
    a = a_ref[...].astype(jnp.bfloat16)

    # Layer 1 (concat fused into the kernel): cat(s, a) @ W1 == s @ W1s + a @ W1a
    h = (jnp.dot(s, w1s_ref[...], preferred_element_type=jnp.float32)
         + jnp.dot(a, w1a_ref[...], preferred_element_type=jnp.float32)
         + b1_ref[...])
    h = jnp.maximum(h, 0.0)                                   # ReLU

    # Layer 2 -> ReLU
    h = jnp.dot(h.astype(jnp.bfloat16), w2_ref[...],
                preferred_element_type=jnp.float32) + b2_ref[...]
    h = jnp.maximum(h, 0.0)

    # Layer 3 -> Hardswish numerator: z * clip(z + 3, 0, 6); the 1/6 is folded
    # into w4 (prepare_params), saving one f32 VPU multiply over [TB, Mp].
    z = jnp.dot(h.astype(jnp.bfloat16), w3_ref[...],
                preferred_element_type=jnp.float32) + b3_ref[...]
    q = z * jnp.clip(z + 3.0, 0.0, 6.0)

    # Layer 4: N=1 output column would waste the MXU and a [TB, 1] store is
    # lane-masked. Instead: VPU multiply by the (1/6-scaled) weight row, then an
    # aligned [TB, Mp] -> [Mp, TB] XLU transpose + sublane reduction, producing a
    # lane-dense [1, TB] row (unmasked stores).
    qw = q * w4_ref[...]                                      # [TB, Mp] f32
    o_ref[...] = jnp.sum(qw.T, axis=0, keepdims=True) + b4_ref[...]


def critic_forward(state, action, params, *, tile_b=None,
                   vmem_budget_bytes=32 * 1024 * 1024):
    """Runs the Critic forward pass. `params` must come from prepare_params().

    `vmem_budget_bytes` sizes the batch tile; the default fits v7x (64 MiB VMEM).
    On v5e/v6e (128 MiB) it can be raised for large mid_dim to keep bigger tiles.
    """
    B, S = state.shape
    Ba, A = action.shape
    assert Ba == B
    (w1s, w1a, b1), (w2, b2), (w3, b3), (w4row, b4) = params
    Mp = w2.shape[0]

    if tile_b is None:
        tile_b = _select_tile_b(B, S, A, Mp, vmem_budget_bytes)
    tile_b = max(LANE, _round_up(tile_b, LANE))
    tile_b = min(tile_b, _round_up(B, LANE))       # never (much) larger than the batch

    # Tiny batches: pad up to one full tile so every block lies inside its array.
    # (For B >= tile_b, a partial last block is handled by the Pallas pipeline and
    #  the garbage rows only affect output lanes that are sliced away below.)
    if B < tile_b:
        pad = tile_b - B
        state = jnp.pad(state, ((0, pad), (0, 0)))
        action = jnp.pad(action, ((0, pad), (0, 0)))
    B_eff = max(B, tile_b)
    num_tiles = pl.cdiv(B_eff, tile_b)
    grid = (num_tiles,)

    def tiled(cols):
        # Per-grid-step batch tile (double-buffered by the Pallas pipeline).
        return pl.BlockSpec((tile_b, cols), lambda i: (i, 0))

    def resident(shape):
        # Same block every grid step -> VMEM-resident; single buffer (no need to
        # double-buffer a block whose index never changes).
        return pl.BlockSpec(shape, lambda i: (0, 0), pipeline_mode=pl.Buffered(1))

    in_bytes = state.dtype.itemsize
    flops = 2 * B * Mp * (S + A + 2 * Mp) + 4 * B * Mp
    bytes_accessed = (B * (S + A) * in_bytes + num_tiles * tile_b * 4   # acts in/out
                      + (S + A + 2 * Mp) * Mp * 2                        # bf16 weights
                      + (4 * Mp + 1) * 4)                                # f32 biases

    est_vmem = _weight_vmem_bytes(S, A, Mp) + _per_row_vmem_bytes(Mp) * tile_b
    vmem_limit = int(min(max(est_vmem * 3 // 2, 32 * 1024 * 1024), 48 * 1024 * 1024))

    out_row = pl.pallas_call(
        _critic_kernel,
        out_shape=jax.ShapeDtypeStruct((1, num_tiles * tile_b), jnp.float32),
        grid_spec=pltpu.PrefetchScalarGridSpec(
            num_scalar_prefetch=0,
            grid=grid,
            in_specs=[
                tiled(S), tiled(A),
                resident((S, Mp)), resident((A, Mp)), resident((1, Mp)),
                resident((Mp, Mp)), resident((1, Mp)),
                resident((Mp, Mp)), resident((1, Mp)),
                resident((1, Mp)), resident((1, 1)),
            ],
            # Lane-dense output: one [1, tile_b] row per grid step.
            out_specs=pl.BlockSpec((1, tile_b), lambda i: (0, i)),
        ),
        compiler_params=pltpu.CompilerParams(
            dimension_semantics=("parallel",),       # shard batch tiles across TCs
            vmem_limit_bytes=vmem_limit,
        ),
        cost_estimate=pl.CostEstimate(
            flops=flops, transcendentals=0, bytes_accessed=bytes_accessed),
    )(state, action, w1s, w1a, b1, w2, b2, w3, b3, w4row, b4)

    return out_row.reshape(-1, 1)[:B]


def init_critic_params(key, state_dim, action_dim, mid_dim):
    """PyTorch-style uniform(+-1/sqrt(fan_in)) init; weights [in, out], biases [1, out]."""
    dims = [(state_dim + action_dim, mid_dim),
            (mid_dim, mid_dim),
            (mid_dim, mid_dim),
            (mid_dim, 1)]
    params = []
    for fan_in, fan_out in dims:
        key, kw, kb = jax.random.split(key, 3)
        bound = 1.0 / jnp.sqrt(fan_in)
        w = jax.random.uniform(kw, (fan_in, fan_out), jnp.float32, -bound, bound)
        b = jax.random.uniform(kb, (1, fan_out), jnp.float32, -bound, bound)
        params.append((w, b))
    return params


def _pad2d(x, rows, cols):
    return jnp.pad(x, ((0, rows - x.shape[0]), (0, cols - x.shape[1])))


def prepare_params(params_f32, state_dim, *, lane=LANE, matmul_dtype=jnp.bfloat16):
    """Kernel-side parameter layout.

    - Split W1 into state/action halves (concat fused into the kernel).
    - Zero-pad the hidden dim to a multiple of 128 lanes (mathematically exact).
    - Cast matmul weights to bf16; biases stay f32.
    - Fold Hardswish's 1/6 into the final weight row (kept f32).
    """
    (w1, b1), (w2, b2), (w3, b3), (w4, b4) = params_f32
    M = w2.shape[0]
    Mp = _round_up(M, lane)

    w1_s, w1_a = w1[:state_dim], w1[state_dim:]
    w1s = _pad2d(w1_s, w1_s.shape[0], Mp).astype(matmul_dtype)
    w1a = _pad2d(w1_a, w1_a.shape[0], Mp).astype(matmul_dtype)
    b1p = _pad2d(b1, 1, Mp)
    w2p = _pad2d(w2, Mp, Mp).astype(matmul_dtype)
    b2p = _pad2d(b2, 1, Mp)
    w3p = _pad2d(w3, Mp, Mp).astype(matmul_dtype)
    b3p = _pad2d(b3, 1, Mp)
    w4row = _pad2d(w4.T, 1, Mp) * (1.0 / 6.0)   # [1, Mp] f32, Hardswish /6 folded in
    return ((w1s, w1a, b1p), (w2p, b2p), (w3p, b3p), (w4row, b4))


def critic_reference(state, action, params_f32):
    """Pure-JAX reference using the same bf16-operand / f32-accumulate matmuls."""
    (w1, b1), (w2, b2), (w3, b3), (w4, b4) = params_f32

    def mm(x, w):
        return jnp.dot(x.astype(jnp.bfloat16), w.astype(jnp.bfloat16),
                       preferred_element_type=jnp.float32)

    x = jnp.concatenate((state, action), axis=1)
    h = jnp.maximum(mm(x, w1) + b1, 0.0)
    h = jnp.maximum(mm(h, w2) + b2, 0.0)
    z = mm(h, w3) + b3
    h = z * jnp.clip(z + 3.0, 0.0, 6.0) / 6.0
    return h @ w4 + b4


if __name__ == "__main__":
    # Small shapes consistent with Critic(mid_dim, state_dim, action_dim)
    batch, state_dim, action_dim, mid_dim = 2, 16, 16, 32

    key = jax.random.PRNGKey(0)
    k_params, k_state, k_action = jax.random.split(key, 3)

    params_f32 = init_critic_params(k_params, state_dim, action_dim, mid_dim)
    params = prepare_params(params_f32, state_dim)

    # Model an upstream producer that already emits bf16 activations (halves the
    # input HBM stream); the kernel also accepts f32.
    state = jax.random.normal(k_state, (batch, state_dim), jnp.float32).astype(jnp.bfloat16)
    action = jax.random.normal(k_action, (batch, action_dim), jnp.float32).astype(jnp.bfloat16)

    out = critic_forward(state, action, params)
    out = jax.block_until_ready(out)

    ref = critic_reference(state, action, params_f32)
    assert out.shape == (batch, 1), out.shape
    assert jnp.allclose(out, ref, atol=2e-2, rtol=2e-2), (out, ref)

    print("KERNEL_OK")
</pallas_src>

<mosaic_0001>
module attributes {stable_mosaic.version = 11 : i64} {
  func.func @_critic_kernel(%arg0: i32, %arg1: memref<128x16xbf16, #tpu.memory_space<vmem>>, %arg2: memref<128x16xbf16, #tpu.memory_space<vmem>>, %arg3: memref<16x128xbf16, #tpu.memory_space<vmem>>, %arg4: memref<16x128xbf16, #tpu.memory_space<vmem>>, %arg5: memref<1x128xf32, #tpu.memory_space<vmem>>, %arg6: memref<128x128xbf16, #tpu.memory_space<vmem>>, %arg7: memref<1x128xf32, #tpu.memory_space<vmem>>, %arg8: memref<128x128xbf16, #tpu.memory_space<vmem>>, %arg9: memref<1x128xf32, #tpu.memory_space<vmem>>, %arg10: memref<1x128xf32, #tpu.memory_space<vmem>>, %arg11: memref<1x1xf32, #tpu.memory_space<vmem>>, %arg12: memref<1x128xf32, #tpu.memory_space<vmem>>) attributes {dimension_semantics = [#tpu.dimension_semantics<parallel>], iteration_bounds = array<i64: 1>, scalar_prefetch = 0 : i64, scratch_operands = 0 : i64, tpu.core_type = #tpu.core_type<tc>, window_params = [{transform_indices = @transform_0, window_bounds = array<i64: 128, 16>}, {transform_indices = @transform_1, window_bounds = array<i64: 128, 16>}, {pipeline_mode = #tpu.pipeline_mode<synchronous>, transform_indices = @transform_2, window_bounds = array<i64: 16, 128>}, {pipeline_mode = #tpu.pipeline_mode<synchronous>, transform_indices = @transform_3, window_bounds = array<i64: 16, 128>}, {pipeline_mode = #tpu.pipeline_mode<synchronous>, transform_indices = @transform_4, window_bounds = array<i64: 1, 128>}, {pipeline_mode = #tpu.pipeline_mode<synchronous>, transform_indices = @transform_5, window_bounds = array<i64: 128, 128>}, {pipeline_mode = #tpu.pipeline_mode<synchronous>, transform_indices = @transform_6, window_bounds = array<i64: 1, 128>}, {pipeline_mode = #tpu.pipeline_mode<synchronous>, transform_indices = @transform_7, window_bounds = array<i64: 128, 128>}, {pipeline_mode = #tpu.pipeline_mode<synchronous>, transform_indices = @transform_8, window_bounds = array<i64: 1, 128>}, {pipeline_mode = #tpu.pipeline_mode<synchronous>, transform_indices = @transform_9, window_bounds = array<i64: 1, 128>}, {pipeline_mode = #tpu.pipeline_mode<synchronous>, transform_indices = @transform_10, window_bounds = array<i64: 1, 1>}, {transform_indices = @transform_11, window_bounds = array<i64: 1, 128>}]} {
    %c0 = arith.constant 0 : index
    %c0_0 = arith.constant 0 : index
    %0 = vector.load %arg1[%c0, %c0_0] : memref<128x16xbf16, #tpu.memory_space<vmem>>, vector<128x16xbf16>
    %c0_1 = arith.constant 0 : index
    %c0_2 = arith.constant 0 : index
    %1 = vector.load %arg2[%c0_1, %c0_2] : memref<128x16xbf16, #tpu.memory_space<vmem>>, vector<128x16xbf16>
    %c0_3 = arith.constant 0 : index
    %c0_4 = arith.constant 0 : index
    %2 = vector.load %arg3[%c0_3, %c0_4] : memref<16x128xbf16, #tpu.memory_space<vmem>>, vector<16x128xbf16>
    %cst = arith.constant dense<0.000000e+00> : vector<128x128xf32>
    %3 = tpu.matmul %0, %2, %cst {dimension_numbers = #tpu.dot_dimension_numbers<[1], [0], [0], [1], [0, 0, 1, 1], [], []>} : vector<128x16xbf16>, vector<16x128xbf16>, vector<128x128xf32> -> vector<128x128xf32>
    %c0_5 = arith.constant 0 : index
    %c0_6 = arith.constant 0 : index
    %4 = vector.load %arg4[%c0_5, %c0_6] : memref<16x128xbf16, #tpu.memory_space<vmem>>, vector<16x128xbf16>
    %cst_7 = arith.constant dense<0.000000e+00> : vector<128x128xf32>
    %5 = tpu.matmul %1, %4, %cst_7 {dimension_numbers = #tpu.dot_dimension_numbers<[1], [0], [0], [1], [0, 0, 1, 1], [], []>} : vector<128x16xbf16>, vector<16x128xbf16>, vector<128x128xf32> -> vector<128x128xf32>
    %6 = arith.addf %3, %5 : vector<128x128xf32>
    %c0_8 = arith.constant 0 : index
    %c0_9 = arith.constant 0 : index
    %7 = vector.load %arg5[%c0_8, %c0_9] : memref<1x128xf32, #tpu.memory_space<vmem>>, vector<1x128xf32>
    %8 = vector.broadcast %7 : vector<1x128xf32> to vector<128x128xf32>
    %9 = arith.addf %6, %8 : vector<128x128xf32>
    %cst_10 = arith.constant 0.000000e+00 : f32
    %10 = vector.broadcast %cst_10 : f32 to vector<128x128xf32>
    %11 = arith.maximumf %9, %10 : vector<128x128xf32>
    %12 = arith.truncf %11 : vector<128x128xf32> to vector<128x128xbf16>
    %c0_11 = arith.constant 0 : index
    %c0_12 = arith.constant 0 : index
    %13 = vector.load %arg6[%c0_11, %c0_12] : memref<128x128xbf16, #tpu.memory_space<vmem>>, vector<128x128xbf16>
    %cst_13 = arith.constant dense<0.000000e+00> : vector<128x128xf32>
    %14 = tpu.matmul %12, %13, %cst_13 {dimension_numbers = #tpu.dot_dimension_numbers<[1], [0], [0], [1], [0, 0, 1, 1], [], []>} : vector<128x128xbf16>, vector<128x128xbf16>, vector<128x128xf32> -> vector<128x128xf32>
    %c0_14 = arith.constant 0 : index
    %c0_15 = arith.constant 0 : index
    %15 = vector.load %arg7[%c0_14, %c0_15] : memref<1x128xf32, #tpu.memory_space<vmem>>, vector<1x128xf32>
    %16 = vector.broadcast %15 : vector<1x128xf32> to vector<128x128xf32>
    %17 = arith.addf %14, %16 : vector<128x128xf32>
    %cst_16 = arith.constant 0.000000e+00 : f32
    %18 = vector.broadcast %cst_16 : f32 to vector<128x128xf32>
    %19 = arith.maximumf %17, %18 : vector<128x128xf32>
    %20 = arith.truncf %19 : vector<128x128xf32> to vector<128x128xbf16>
    %c0_17 = arith.constant 0 : index
    %c0_18 = arith.constant 0 : index
    %21 = vector.load %arg8[%c0_17, %c0_18] : memref<128x128xbf16, #tpu.memory_space<vmem>>, vector<128x128xbf16>
    %cst_19 = arith.constant dense<0.000000e+00> : vector<128x128xf32>
    %22 = tpu.matmul %20, %21, %cst_19 {dimension_numbers = #tpu.dot_dimension_numbers<[1], [0], [0], [1], [0, 0, 1, 1], [], []>} : vector<128x128xbf16>, vector<128x128xbf16>, vector<128x128xf32> -> vector<128x128xf32>
    %c0_20 = arith.constant 0 : index
    %c0_21 = arith.constant 0 : index
    %23 = vector.load %arg9[%c0_20, %c0_21] : memref<1x128xf32, #tpu.memory_space<vmem>>, vector<1x128xf32>
    %24 = vector.broadcast %23 : vector<1x128xf32> to vector<128x128xf32>
    %25 = arith.addf %22, %24 : vector<128x128xf32>
    %cst_22 = arith.constant 3.000000e+00 : f32
    %26 = vector.broadcast %cst_22 : f32 to vector<128x128xf32>
    %27 = arith.addf %25, %26 : vector<128x128xf32>
    %cst_23 = arith.constant 0.000000e+00 : f32
    %cst_24 = arith.constant 6.000000e+00 : f32
    %28 = vector.broadcast %cst_23 : f32 to vector<128x128xf32>
    %29 = arith.maximumf %28, %27 : vector<128x128xf32>
    %30 = vector.broadcast %cst_24 : f32 to vector<128x128xf32>
    %31 = arith.minimumf %30, %29 : vector<128x128xf32>
    %32 = arith.mulf %25, %31 : vector<128x128xf32>
    %c0_25 = arith.constant 0 : index
    %c0_26 = arith.constant 0 : index
    %33 = vector.load %arg10[%c0_25, %c0_26] : memref<1x128xf32, #tpu.memory_space<vmem>>, vector<1x128xf32>
    %34 = vector.broadcast %33 : vector<1x128xf32> to vector<128x128xf32>
    %35 = arith.mulf %32, %34 : vector<128x128xf32>
    %36 = tpu.transpose %35, [1, 0] : vector<128x128xf32> -> vector<128x128xf32>
    %cst_27 = arith.constant dense<0.000000e+00> : vector<128xf32>
    %37 = vector.multi_reduction <add>, %36, %cst_27 [0] : vector<128x128xf32> to vector<128xf32>
    %38 = vector.shape_cast %37 : vector<128xf32> to vector<1x128xf32>
    %c0_28 = arith.constant 0 : index
    %c0_29 = arith.constant 0 : index
    %39 = vector.load %arg11[%c0_28, %c0_29] : memref<1x1xf32, #tpu.memory_space<vmem>>, vector<1x1xf32>
    %40 = vector.broadcast %39 : vector<1x1xf32> to vector<1x128xf32>
    %41 = arith.addf %38, %40 : vector<1x128xf32>
    %c0_30 = arith.constant 0 : index
    %c0_31 = arith.constant 0 : index
    %42 = vector.load %arg12[%c0_30, %c0_31] : memref<1x128xf32, #tpu.memory_space<vmem>>, vector<1x128xf32>
    tpu.vector_store %arg12[%c0_30, %c0_31], %41 {strides = array<i32>} : memref<1x128xf32, #tpu.memory_space<vmem>>, vector<1x128xf32>,
    return
  }
  func.func @transform_0(%arg0: i32) -> (i32, i32) {
    %c0_i32 = arith.constant 0 : i32
    %c0_i32_0 = arith.constant 0 : i32
    return %arg0, %c0_i32 : i32, i32
  }
  func.func @transform_1(%arg0: i32) -> (i32, i32) {
    %c0_i32 = arith.constant 0 : i32
    %c0_i32_0 = arith.constant 0 : i32
    return %arg0, %c0_i32 : i32, i32
  }
  func.func @transform_2(%arg0: i32) -> (i32, i32) {
    %c0_i32 = arith.constant 0 : i32
    %c0_i32_0 = arith.constant 0 : i32
    %c0_i32_1 = arith.constant 0 : i32
    return %c0_i32, %c0_i32_0 : i32, i32
  }
  func.func @transform_3(%arg0: i32) -> (i32, i32) {
    %c0_i32 = arith.constant 0 : i32
    %c0_i32_0 = arith.constant 0 : i32
    %c0_i32_1 = arith.constant 0 : i32
    return %c0_i32, %c0_i32_0 : i32, i32
  }
  func.func @transform_4(%arg0: i32) -> (i32, i32) {
    %c0_i32 = arith.constant 0 : i32
    %c0_i32_0 = arith.constant 0 : i32
    %c0_i32_1 = arith.constant 0 : i32
    return %c0_i32, %c0_i32_0 : i32, i32
  }
  func.func @transform_5(%arg0: i32) -> (i32, i32) {
    %c0_i32 = arith.constant 0 : i32
    %c0_i32_0 = arith.constant 0 : i32
    %c0_i32_1 = arith.constant 0 : i32
    return %c0_i32, %c0_i32_0 : i32, i32
  }
  func.func @transform_6(%arg0: i32) -> (i32, i32) {
    %c0_i32 = arith.constant 0 : i32
    %c0_i32_0 = arith.constant 0 : i32
    %c0_i32_1 = arith.constant 0 : i32
    return %c0_i32, %c0_i32_0 : i32, i32
  }
  func.func @transform_7(%arg0: i32) -> (i32, i32) {
    %c0_i32 = arith.constant 0 : i32
    %c0_i32_0 = arith.constant 0 : i32
    %c0_i32_1 = arith.constant 0 : i32
    return %c0_i32, %c0_i32_0 : i32, i32
  }
  func.func @transform_8(%arg0: i32) -> (i32, i32) {
    %c0_i32 = arith.constant 0 : i32
    %c0_i32_0 = arith.constant 0 : i32
    %c0_i32_1 = arith.constant 0 : i32
    return %c0_i32, %c0_i32_0 : i32, i32
  }
  func.func @transform_9(%arg0: i32) -> (i32, i32) {
    %c0_i32 = arith.constant 0 : i32
    %c0_i32_0 = arith.constant 0 : i32
    %c0_i32_1 = arith.constant 0 : i32
    return %c0_i32, %c0_i32_0 : i32, i32
  }
  func.func @transform_10(%arg0: i32) -> (i32, i32) {
    %c0_i32 = arith.constant 0 : i32
    %c0_i32_0 = arith.constant 0 : i32
    %c0_i32_1 = arith.constant 0 : i32
    return %c0_i32, %c0_i32_0 : i32, i32
  }
  func.func @transform_11(%arg0: i32) -> (i32, i32) {
    %c0_i32 = arith.constant 0 : i32
    %c0_i32_0 = arith.constant 0 : i32
    return %c0_i32, %arg0 : i32, i32
  }
}

</mosaic_0001>

<bundles_post_ra>
// kernel: tpu_custom_call.1
= control target key start
LH: loop header
LB: loop body
LE: loop exit
PB: predicated region body
PF: predicated region fallthrough
CT: control target
= control target key end

     0   :  { %s1565_s0 = inlined_call_operand.vmem [shape: bf16[128,16], index: 0, kind: input, shape index: {}]   ;;  %s1566_s1 = inlined_call_operand.vmem [shape: bf16[128,16], index: 1, kind: input, shape index: {}]   ;;  %s1567_s2 = inlined_call_operand.vmem [shape: bf16[16,128], index: 2, kind: input, shape index: {}]   ;;  %s1568_s3 = inlined_call_operand.vmem [shape: bf16[16,128], index: 3, kind: input, shape index: {}]   ;;  %s1569_s4 = inlined_call_operand.vmem [shape: f32[1,128], index: 4, kind: input, shape index: {}]   ;;  %s1570_s5 = inlined_call_operand.vmem [shape: bf16[128,128], index: 5, kind: input, shape index: {}]   ;;  %s1571_s6 = inlined_call_operand.vmem [shape: f32[1,128], index: 6, kind: input, shape index: {}]   ;;  %s1572_s7 = inlined_call_operand.vmem [shape: bf16[128,128], index: 7, kind: input, shape index: {}]   ;;  %s1573_s8 = inlined_call_operand.vmem [shape: f32[1,128], index: 8, kind: input, shape index: {}]   ;;  %s1574_s9 = inlined_call_operand.vmem [shape: f32[1,128], index: 9, kind: input, shape index: {}]   ;;  %s1575_s10 = inlined_call_operand.<no memory space> [shape: f32[1,1], index: 10, kind: input, shape index: {}]   ;;  %s1576_s11 = inlined_call_operand.hbm [shape: f32[1,128], index: 11, kind: output, shape index: {}]  }
   0x1   :  { %v16_v0 = vstv %s1575_s10 }
   0x2   :  { %17 = vst [vmem:[#allocation2] sm:$0x1] %v16_v0 }
   0x3   :  { %v1226_v1 = vld [vmem:[%s1568_s3] sm:$0xff]   ;;  %vm124_vm0 = vcmask 130048   ;;  %v1228_v3 = vld [vmem:[%s1566_s1 + $0x8] sm:$0xff]   ;;  %v1230_v5 = vld [vmem:[%s1566_s1 + $0x10] sm:$0xff]  }
   0x4   :  { %v1227_v2 = vld [vmem:[%s1566_s1] sm:$0xff]   ;;  %1090 = vmatprep.subr.bf16.mxu0 %v1226_v1  ;;  %v1231_v6 = vld [vmem:[%s1566_s1 + $0x18] sm:$0xff]   ;;  %v1233_v8 = vld [vmem:[%s1566_s1 + $0x28] sm:$0xff]  }
   0x5   :  { %1091 = vmatpush3.bf16.msra.mxu0 %v1226_v1  ;;  %1092 = vmatprep.mubr.msk.bf16.mxu0 %vm124_vm0, %v1227_v2  ;;  %v1229_v4 = vld [vmem:[%s1567_s2] sm:$0xff]   ;;  %v1234_v9 = vld [vmem:[%s1566_s1 + $0x30] sm:$0xff]   ;;  %v1245_v11 = vld [vmem:[%s1570_s5 + $0x8] sm:$0xff]  }
   0x6   :  { %1108 = vmatprep.subr.bf16.mxu0 %v1229_v4  ;;  %v1232_v7 = vld [vmem:[%s1566_s1 + $0x20] sm:$0xff]   ;;  %v1246_v12 = vld [vmem:[%s1570_s5 + $0x10] sm:$0xff]   ;;  %v1235_v13 = vld [vmem:[%s1566_s1 + $0x38] sm:$0xff]  }
   0x7   :  { %v1244_v10 = vld [vmem:[%s1570_s5] sm:$0xff]   ;;  %v1247_v14 = vld [vmem:[%s1570_s5 + $0x18] sm:$0xff]  }
   0x8   :  { %1093 = vmatmul.mubr.msk.bf16.vlgmr.msra.gmra.mrb[0].mxu0 %vm124_vm0, %v1228_v3  ;;  %1126 = vmatprep.subr.bf16.mxu1 %v1244_v10  ;;  %v1236_v15 = vld [vmem:[%s1565_s0] sm:$0xff]  }
   0x9   :  { %1109 = vmatpush3.bf16.msra.mxu0 %v1229_v4  ;;  %1096 = vmatprep.mubr.msk.bf16.mxu0 %vm124_vm0, %v1230_v5  ;;  %v1248_v16 = vld [vmem:[%s1570_s5 + $0x20] sm:$0xff]  }
   0xa   :  { %1127 = vmatpush3.bf16.msra.mxu1 %v1244_v10 }
   0xb   :  { %1128 = vmatprep.subr.bf16.mxu1 %v1245_v11 }
   0xe   :  { %1129 = vmatpush3.bf16.msra.mxu1 %v1245_v11 }
   0xf   :  { %1130 = vmatprep.subr.bf16.mxu1 %v1246_v12 }
  0x10   :  { %1097 = vmatmul.mubr.msk.bf16.gmra.mrb[4].mxu0 %vm124_vm0, %v1231_v6 }
  0x11   :  { %1100 = vmatprep.mubr.msk.bf16.mxu0 %vm124_vm0, %v1232_v7 }
  0x12   :  { %1131 = vmatpush3.bf16.msra.mxu1 %v1246_v12 }
  0x13   :  { %1132 = vmatprep.subr.bf16.mxu1 %v1247_v14 }
  0x18   :  { %1101 = vmatmul.mubr.msk.bf16.gmra.mrb[8].mxu0 %vm124_vm0, %v1233_v8 }
  0x19   :  { %1104 = vmatprep.mubr.msk.bf16.mxu0 %vm124_vm0, %v1234_v9 }
  0x20   :  { %1105 = vmatmul.mubr.msk.bf16.gmra.mrb[12].mxu0 %vm124_vm0, %v1235_v13 }
  0x21   :  { %18 = vsyncpa [#allocation4], 0  ;;  %1110 = vmatprep.mubr.msk.bf16.mxu0 %vm124_vm0, %v1236_v15  ;;  %1133 = vmatpush3.bf16.msra.mxu1 %v1247_v14  ;;  %v1237_v17 = vld [vmem:[%s1565_s0 + $0x8] sm:$0xff]   ;;  %v1238_v19 = vld [vmem:[%s1565_s0 + $0x10] sm:$0xff]  }
  0x22   :  { %1134 = vmatprep.subr.bf16.mxu1 %v1248_v16  ;;  %v1249_v18 = vld [vmem:[%s1570_s5 + $0x28] sm:$0xff]   ;;  %v1239_v20 = vld [vmem:[%s1565_s0 + $0x18] sm:$0xff]   ;;  %v1240_v21 = vld [vmem:[%s1565_s0 + $0x20] sm:$0xff]  }
  0x23   :  { %v1241_v22 = vld [vmem:[%s1565_s0 + $0x28] sm:$0xff]   ;;  %v1242_v23 = vld [vmem:[%s1565_s0 + $0x30] sm:$0xff]   ;;  %v1243_v24 = vld [vmem:[%s1565_s0 + $0x38] sm:$0xff]  }
  0x24   :  { %v1250_v25 = vld [vmem:[%s1570_s5 + $0x30] sm:$0xff]   ;;  %v1251_v26 = vld [vmem:[%s1570_s5 + $0x38] sm:$0xff]   ;;  %v1252_v27 = vld [vmem:[%s1572_s7] sm:$0xff]  }
  0x25   :  { %1135 = vmatpush3.bf16.msra.mxu1 %v1248_v16  ;;  %v1253_v28 = vld [vmem:[%s1572_s7 + $0x8] sm:$0xff]   ;;  %1158 = vmatprep.subr.bf16.mxu0 %v1252_v27  ;;  %v1254_v29 = vld [vmem:[%s1572_s7 + $0x10] sm:$0xff]   ;;  %v1455_v30 = vld [vmem:[%s1572_s7 + $0x18] sm:$0xff]  }
  0x26   :  { %1136 = vmatprep.subr.bf16.mxu1 %v1249_v18  ;;  %v1461_v31 = vld [vmem:[%s1572_s7 + $0x20] sm:$0xff]   ;;  %v1468_v32 = vld [vmem:[%s1572_s7 + $0x28] sm:$0xff]  }
  0x27   :  { %v1476_v33 = vld [vmem:[%s1569_s4] ss:$0 sm:$0xff] }
  0x28   :  { %1111 = vmatmul.mubr.msk.bf16.vlgmr.msra.gmra.mrb[0].mxu0 %vm124_vm0, %v1237_v17 }
  0x29   :  { %1114 = vmatprep.mubr.msk.bf16.mxu0 %vm124_vm0, %v1238_v19  ;;  %1137 = vmatpush3.bf16.msra.mxu1 %v1249_v18 }
  0x2a   :  { %1138 = vmatprep.subr.bf16.mxu1 %v1250_v25  ;;  %1159 = vmatpush3.bf16.msra.mxu0 %v1252_v27 }
  0x2b   :  { %1160 = vmatprep.subr.bf16.mxu0 %v1253_v28 }
  0x2d   :  { %1139 = vmatpush3.bf16.msra.mxu1 %v1250_v25 }
  0x2e   :  { %1140 = vmatprep.subr.bf16.mxu1 %v1251_v26  ;;  %1161 = vmatpush3.bf16.msra.mxu0 %v1253_v28 }
  0x2f   :  { %1162 = vmatprep.subr.bf16.mxu0 %v1254_v29 }
  0x30   :  { %1115 = vmatmul.mubr.msk.bf16.gmra.mrb[4].mxu0 %vm124_vm0, %v1239_v20 }
  0x31   :  { %1118 = vmatprep.mubr.msk.bf16.mxu0 %vm124_vm0, %v1240_v21  ;;  %1141 = vmatpush3.bf16.msra.mxu1 %v1251_v26  ;;  %v1258_v26 = vld [vmem:[%s1572_s7 + $0x30] sm:$0xff]  }
  0x32   :  { %1190 = vmatprep.subr.bf16.mxu1 %v1252_v27  ;;  %1163 = vmatpush3.bf16.msra.mxu0 %v1254_v29 }
  0x33   :  { %1164 = vmatprep.subr.bf16.mxu0 %v1455_v30 }
  0x36   :  { %1165 = vmatpush3.bf16.msra.mxu0 %v1455_v30 }
  0x37   :  { %1166 = vmatprep.subr.bf16.mxu0 %v1461_v31 }
  0x38   :  { %1119 = vmatmul.mubr.msk.bf16.gmra.mrb[8].mxu0 %vm124_vm0, %v1241_v22 }
  0x39   :  { %1122 = vmatprep.mubr.msk.bf16.mxu0 %vm124_vm0, %v1242_v23 }
  0x3a   :  { %1167 = vmatpush3.bf16.msra.mxu0 %v1461_v31 }
  0x3b   :  { %1168 = vmatprep.subr.bf16.mxu0 %v1468_v32 }
  0x3e   :  { %1169 = vmatpush3.bf16.msra.mxu0 %v1468_v32 }
  0x3f   :  { %1170 = vmatprep.subr.bf16.mxu0 %v1258_v26 }
  0x40   :  { %1123 = vmatmul.mubr.msk.bf16.gmra.mrb[12].mxu0 %vm124_vm0, %v1243_v24 }
  0x42   :  { %1171 = vmatpush3.bf16.msra.mxu0 %v1258_v26 }
  0xfb   :  { %v1112_v34 = vpop.f32.mrb[0].mxu0 }
  0xfc   :  { %v422_v35 = vadd.f32 %v1112_v34, %v1476_v33  ;;  %v350_v36 = vpop.f32.mrb[1].mxu0 }
  0xfd   :  { %v420_v37 = vadd.f32 %v1476_v33, %v350_v36  ;;  %v1113_v38 = vpop.f32.mrb[2].mxu0 }
  0xfe   :  { %v423_v39 = vadd.f32 %v1113_v38, %v1476_v33  ;;  %v353_v40 = vpop.f32.mrb[3].mxu0  ;;  %v438_v42 = vmax.f32 %v422_v35, 0.0 }
  0xff   :  { %v421_v41 = vadd.f32 %v1476_v33, %v353_v40  ;;  %v436_v44 = vmax.f32 %v420_v37, 0.0 }
 0x100   :  { %v439_v43 = vmax.f32 %v423_v39, 0.0 }
 0x101   :  { %v437_v45 = vmax.f32 %v421_v41, 0.0 }
 0x102   :  { %v453_v46 = vpack.c.bf16 %v439_v43, %v438_v42 }
 0x103   :  { %v1116_v47 = vpop.f32.mrb[4].mxu0  ;;  %v452_v48 = vpack.c.bf16 %v437_v45, %v436_v44 }
 0x104   :  { %v426_v49 = vadd.f32 %v1116_v47, %v1476_v33  ;;  %v366_v50 = vpop.f32.mrb[5].mxu0 }
 0x105   :  { %v424_v51 = vadd.f32 %v1476_v33, %v366_v50  ;;  %v1117_v52 = vpop.f32.mrb[6].mxu0  ;;  %1142 = vmatprep.mubr.bf16.mxu1 %v452_v48 }
 0x106   :  { %v427_v53 = vadd.f32 %v1117_v52, %v1476_v33  ;;  %v369_v54 = vpop.f32.mrb[7].mxu0  ;;  %1143 = vmatmul.mubr.bf16.vlgmr.msra.gmra.mrb[0].mxu1 %v453_v46  ;;  %v442_v56 = vmax.f32 %v426_v49, 0.0 }
 0x107   :  { %v425_v55 = vadd.f32 %v1476_v33, %v369_v54  ;;  %1198 = vmatpush3.bf16.msra.mxu1 %v1252_v27  ;;  %v440_v58 = vmax.f32 %v424_v51, 0.0  ;;  %v1259_v27 = vld [vmem:[%s1572_s7 + $0x38] sm:$0xff]  }
 0x108   :  { %v443_v57 = vmax.f32 %v427_v53, 0.0  ;;  %1191 = vmatprep.subr.bf16.mxu1 %v1253_v28  ;;  %1172 = vmatprep.subr.bf16.mxu0 %v1259_v27 }
 0x109   :  { %v441_v59 = vmax.f32 %v425_v55, 0.0  ;;  %1173 = vmatpush3.bf16.msra.mxu0 %v1259_v27 }
 0x10a   :  { %v455_v60 = vpack.c.bf16 %v443_v57, %v442_v56 }
 0x10b   :  { %v454_v61 = vpack.c.bf16 %v441_v59, %v440_v58  ;;  %v1120_v62 = vpop.f32.mrb[8].mxu0  ;;  %1199 = vmatpush3.bf16.msra.mxu1 %v1253_v28  ;;  %v1021_v28 = vld [vmem:[%s1571_s6] ss:$0 sm:$0xff] }
 0x10c   :  { %v430_v63 = vadd.f32 %v1120_v62, %v1476_v33  ;;  %v382_v0 = vpop.f32.mrb[9].mxu0  ;;  %1192 = vmatprep.subr.bf16.mxu1 %v1254_v29 }
 0x10d   :  { %v428_v1 = vadd.f32 %v1476_v33, %v382_v0  ;;  %v1121_v2 = vpop.f32.mrb[10].mxu0  ;;  %1146 = vmatprep.mubr.bf16.mxu1 %v454_v61 }
 0x10e   :  { %v431_v3 = vadd.f32 %v1121_v2, %v1476_v33  ;;  %v385_v4 = vpop.f32.mrb[11].mxu0  ;;  %1147 = vmatmul.mubr.bf16.gmra.mrb[4].mxu1 %v455_v60  ;;  %v446_v6 = vmax.f32 %v430_v63, 0.0 }
 0x10f   :  { %v429_v5 = vadd.f32 %v1476_v33, %v385_v4  ;;  %1200 = vmatpush3.bf16.msra.mxu1 %v1254_v29  ;;  %v444_v8 = vmax.f32 %v428_v1, 0.0 }
 0x110   :  { %v447_v7 = vmax.f32 %v431_v3, 0.0  ;;  %1193 = vmatprep.subr.bf16.mxu1 %v1455_v30 }
 0x111   :  { %v445_v9 = vmax.f32 %v429_v5, 0.0 }
 0x112   :  { %v457_v10 = vpack.c.bf16 %v447_v7, %v446_v6 }
 0x113   :  { %v456_v11 = vpack.c.bf16 %v445_v9, %v444_v8  ;;  %v1124_v12 = vpop.f32.mrb[12].mxu0  ;;  %1201 = vmatpush3.bf16.msra.mxu1 %v1455_v30 }
 0x114   :  { %v434_v13 = vadd.f32 %v1124_v12, %v1476_v33  ;;  %v398_v14 = vpop.f32.mrb[13].mxu0  ;;  %1194 = vmatprep.subr.bf16.mxu1 %v1461_v31 }
 0x115   :  { %v432_v15 = vadd.f32 %v1476_v33, %v398_v14  ;;  %v1125_v16 = vpop.f32.mrb[14].mxu0  ;;  %1150 = vmatprep.mubr.bf16.mxu1 %v456_v11 }
 0x116   :  { %v435_v17 = vadd.f32 %v1125_v16, %v1476_v33  ;;  %v401_v18 = vpop.f32.mrb[15].mxu0  ;;  %1151 = vmatmul.mubr.bf16.gmra.mrb[8].mxu1 %v457_v10  ;;  %v450_v20 = vmax.f32 %v434_v13, 0.0 }
 0x117   :  { %v433_v19 = vadd.f32 %v1476_v33, %v401_v18  ;;  %1202 = vmatpush3.bf16.msra.mxu1 %v1461_v31  ;;  %v448_v22 = vmax.f32 %v432_v15, 0.0 }
 0x118   :  { %v451_v21 = vmax.f32 %v435_v17, 0.0  ;;  %1195 = vmatprep.subr.bf16.mxu1 %v1468_v32 }
 0x119   :  { %v449_v23 = vmax.f32 %v433_v19, 0.0 }
 0x11a   :  { %v459_v24 = vpack.c.bf16 %v451_v21, %v450_v20  ;;  %v960_v21 = vld [vmem:[#allocation2] sm:$0x1] }
 0x11b   :  { %v458_v25 = vpack.c.bf16 %v449_v23, %v448_v22  ;;  %1203 = vmatpush3.bf16.msra.mxu1 %v1468_v32  ;;  %v1284_v22 = vmov 0   ;;  %v1513_v23 = vld [vmem:[%s1573_s8] ss:$0 sm:$0xff] }
 0x11c   :  { %1196 = vmatprep.subr.bf16.mxu1 %v1258_v26  ;;  %1224 = vset.pattern.permute.xlu1 %v1284_v22 }
 0x11d   :  { %1154 = vmatprep.mubr.bf16.mxu1 %v458_v25  ;;  %963 = vperm.xlu1 %1224, %v960_v21  }
 0x11e   :  { %1155 = vmatmul.mubr.bf16.gmra.mrb[12].mxu1 %v459_v24 }
 0x11f   :  { %1204 = vmatpush3.bf16.msra.mxu1 %v1258_v26 }
 0x120   :  { %1197 = vmatprep.subr.bf16.mxu1 %v1259_v27 }
 0x123   :  { %1205 = vmatpush3.bf16.msra.mxu1 %v1259_v27 }
 0x1d9   :  { %v1144_v29 = vpop.f32.mrb[0].mxu1 }
 0x1da   :  { %v574_v30 = vadd.f32 %v1144_v29, %v1021_v28  ;;  %v565_v31 = vpop.f32.mrb[1].mxu1 }
 0x1db   :  { %v566_v32 = vadd.f32 %v1021_v28, %v565_v31  ;;  %v1145_v33 = vpop.f32.mrb[2].mxu1 }
 0x1dc   :  { %v577_v34 = vadd.f32 %v1145_v33, %v1021_v28  ;;  %v568_v35 = vpop.f32.mrb[3].mxu1  ;;  %v630_v37 = vmax.f32 %v574_v30, 0.0 }
 0x1dd   :  { %v569_v36 = vadd.f32 %v1021_v28, %v568_v35  ;;  %v628_v39 = vmax.f32 %v566_v32, 0.0 }
 0x1de   :  { %v631_v38 = vmax.f32 %v577_v34, 0.0 }
 0x1df   :  { %v629_v40 = vmax.f32 %v569_v36, 0.0 }
 0x1e0   :  { %v645_v41 = vpack.c.bf16 %v631_v38, %v630_v37 }
 0x1e1   :  { %v644_v42 = vpack.c.bf16 %v629_v40, %v628_v39  ;;  %v1148_v43 = vpop.f32.mrb[4].mxu1 }
 0x1e2   :  { %v590_v44 = vadd.f32 %v1148_v43, %v1021_v28  ;;  %v581_v45 = vpop.f32.mrb[5].mxu1 }
 0x1e3   :  { %v582_v46 = vadd.f32 %v1021_v28, %v581_v45  ;;  %v1149_v47 = vpop.f32.mrb[6].mxu1  ;;  %1174 = vmatprep.mubr.bf16.mxu0 %v644_v42  ;;  %v1522_v42 = vld [vmem:[%s1574_s9] ss:$0 sm:$0xff]  ;;  %s1285_s9 = smov [#allocation3]  }
 0x1e4   :  { %v593_v48 = vadd.f32 %v1149_v47, %v1021_v28  ;;  %v584_v49 = vpop.f32.mrb[7].mxu1  ;;  %1175 = vmatmul.mubr.bf16.vlgmr.msra.gmra.mrb[16].mxu0 %v645_v41  ;;  %v634_v51 = vmax.f32 %v590_v44, 0.0  ;;  %s978_s21 = sshll.u32 %s1285_s9, 4  ;;  %s979_s21 = int_to_ptr.vmem [resolvable:$true] %s978_s21 }
 0x1e5   :  { %v585_v50 = vadd.f32 %v1021_v28, %v584_v49  ;;  %v632_v53 = vmax.f32 %v582_v46, 0.0  ;;  %s1260_s22 = scalar_lea.vmem %s979_s21, 16  ;;  %s1264_s23 = scalar_lea.vmem %s979_s21, 32 }
 0x1e6   :  { %v635_v52 = vmax.f32 %v593_v48, 0.0  ;;  %p1261_p0 = scmp.ne.s32.totalorder %s979_s21, %s1260_s22  ;;  %p1265_p1 = scmp.lt.s32.totalorder %s979_s21, %s979_s21 }
 0x1e7   :  { %v633_v54 = vmax.f32 %v585_v50, 0.0  ;;  %p1266_p2 = scmp.lt.s32.totalorder %s1264_s23, %s1260_s22 }
 0x1e8   :  { %v647_v55 = vpack.c.bf16 %v635_v52, %v634_v51 }
 0x1e9   :  { %v646_v56 = vpack.c.bf16 %v633_v54, %v632_v53  ;;  %v1152_v57 = vpop.f32.mrb[8].mxu1  ;;  %p1267_p3 = por %p1266_p2, %p1265_p1 }
 0x1ea   :  { %v606_v58 = vadd.f32 %v1152_v57, %v1021_v28  ;;  %v597_v59 = vpop.f32.mrb[9].mxu1 }
 0x1eb   :  { %v598_v60 = vadd.f32 %v1021_v28, %v597_v59  ;;  %v1153_v61 = vpop.f32.mrb[10].mxu1  ;;  %1178 = vmatprep.mubr.bf16.mxu1 %v646_v56  ;;  %p1268_p4 = pnand %p1267_p3, %p1261_p0 }
 0x1ec   :  { %v609_v62 = vadd.f32 %v1153_v61, %v1021_v28  ;;  %v600_v63 = vpop.f32.mrb[11].mxu1  ;;  %1179 = vmatmul.mubr.bf16.vlgmr.msra.gmra.mrb[16].mxu1 %v647_v55  ;;  %v638_v1 = vmax.f32 %v606_v58, 0.0 }
 0x1ed   :  { %v601_v0 = vadd.f32 %v1021_v28, %v600_v63  ;;  %v636_v3 = vmax.f32 %v598_v60, 0.0 }
 0x1ee   :  { %v639_v2 = vmax.f32 %v609_v62, 0.0 }
 0x1ef   :  { %v637_v4 = vmax.f32 %v601_v0, 0.0 }
 0x1f0   :  { %v649_v5 = vpack.c.bf16 %v639_v2, %v638_v1 }
 0x1f1   :  { %v648_v6 = vpack.c.bf16 %v637_v4, %v636_v3  ;;  %v1156_v7 = vpop.f32.mrb[12].mxu1 }
 0x1f2   :  { %v622_v8 = vadd.f32 %v1156_v7, %v1021_v28  ;;  %v613_v9 = vpop.f32.mrb[13].mxu1 }
 0x1f3   :  { %v614_v10 = vadd.f32 %v1021_v28, %v613_v9  ;;  %v1157_v11 = vpop.f32.mrb[14].mxu1  ;;  %1182 = vmatprep.mubr.bf16.mxu1 %v648_v6 }
 0x1f4   :  { %v625_v12 = vadd.f32 %v1157_v11, %v1021_v28  ;;  %v616_v13 = vpop.f32.mrb[15].mxu1  ;;  %1183 = vmatmul.mubr.bf16.gmra.mrb[20].mxu1 %v649_v5  ;;  %v642_v15 = vmax.f32 %v622_v8, 0.0 }
 0x1f5   :  { %v617_v14 = vadd.f32 %v1021_v28, %v616_v13  ;;  %v640_v17 = vmax.f32 %v614_v10, 0.0 }
 0x1f6   :  { %v643_v16 = vmax.f32 %v625_v12, 0.0 }
 0x1f7   :  { %v641_v18 = vmax.f32 %v617_v14, 0.0 }
 0x1f8   :  { %v651_v19 = vpack.c.bf16 %v643_v16, %v642_v15 }
 0x1f9   :  { %v650_v20 = vpack.c.bf16 %v641_v18, %v640_v17 }
 0x1fb   :  { %1186 = vmatprep.mubr.bf16.mxu1 %v650_v20 }
 0x1fc   :  { %1187 = vmatmul.mubr.bf16.gmra.mrb[24].mxu1 %v651_v19 }
 0x2b7   :  { %v1176_v24 = vpop.f32.mrb[16].mxu0 }
 0x2b8   :  { %v766_v25 = vadd.f32 %v1176_v24, %v1513_v23  ;;  %v757_v26 = vpop.f32.mrb[17].mxu0 }
 0x2b9   :  { %v758_v27 = vadd.f32 %v1513_v23, %v757_v26  ;;  %v1177_v28 = vpop.f32.mrb[18].mxu0 }
 0x2ba   :  { %v822_v29 = vadd.f32 3.0, %v766_v25  ;;  %v769_v30 = vadd.f32 %v1177_v28, %v1513_v23  ;;  %v760_v31 = vpop.f32.mrb[19].mxu0 }
 0x2bb   :  { %v820_v32 = vadd.f32 3.0, %v758_v27  ;;  %v761_v33 = vadd.f32 %v1513_v23, %v760_v31 }
 0x2bc   :  { %v838_v36 = vmax.f32 %v822_v29, 0.0  ;;  %v823_v37 = vadd.f32 3.0, %v769_v30 }
 0x2bd   :  { %v836_v34 = vmax.f32 %v820_v32, 0.0  ;;  %v821_v35 = vadd.f32 3.0, %v761_v33 }
 0x2be   :  { %v854_v47 = vmin.f32 %v838_v36, 6.0  ;;  %v839_v48 = vmax.f32 %v823_v37, 0.0 }
 0x2bf   :  { %v852_v38 = vmin.f32 %v836_v34, 6.0  ;;  %v837_v39 = vmax.f32 %v821_v35, 0.0  ;;  %v1180_v40 = vpop.f32.mrb[16].mxu1 }
 0x2c0   :  { %v773_v41 = vpop.f32.mrb[17].mxu1  ;;  %v870_v54 = vmul.f32 %v854_v47, %v766_v25  ;;  %v782_v55 = vadd.f32 %v1180_v40, %v1513_v23  ;;  %v855_v56 = vmin.f32 %v839_v48, 6.0 }
 0x2c1   :  { %v853_v43 = vmin.f32 %v837_v39, 6.0  ;;  %v774_v44 = vadd.f32 %v1513_v23, %v773_v41  ;;  %v1181_v45 = vpop.f32.mrb[18].mxu1  ;;  %v868_v46 = vmul.f32 %v852_v38, %v758_v27 }
 0x2c2   :  { %v776_v49 = vpop.f32.mrb[19].mxu1  ;;  %v826_v63 = vadd.f32 3.0, %v782_v55  ;;  %v785_v0 = vadd.f32 %v1181_v45, %v1513_v23  ;;  %v871_v2 = vmul.f32 %v855_v56, %v769_v30  ;;  %v893_v5 = vmul.f32 %v1522_v42, %v870_v54 }
 0x2c3   :  { %v869_v50 = vmul.f32 %v853_v43, %v761_v33  ;;  %v824_v51 = vadd.f32 3.0, %v774_v44  ;;  %v777_v52 = vadd.f32 %v1513_v23, %v776_v49  ;;  %v891_v53 = vmul.f32 %v1522_v42, %v868_v46 }
 0x2c4   :  { %v842_v6 = vmax.f32 %v826_v63, 0.0  ;;  %v827_v7 = vadd.f32 3.0, %v785_v0  ;;  %v894_v12 = vmul.f32 %v1522_v42, %v871_v2 }
 0x2c5   :  { %907 = vxpose.xlu0.b32.start [1/16] %v891_v53, 128  ;;  %v840_v57 = vmax.f32 %v824_v51, 0.0  ;;  %v825_v58 = vadd.f32 3.0, %v777_v52  ;;  %v892_v60 = vmul.f32 %v1522_v42, %v869_v50 }
 0x2c6   :  { %v858_v15 = vmin.f32 %v842_v6, 6.0  ;;  %v843_v16 = vmax.f32 %v827_v7, 0.0 }
 0x2c7   :  { %v1184_v59 = vpop.f32.mrb[20].mxu1  ;;  %v856_v3 = vmin.f32 %v840_v57, 6.0  ;;  %v841_v4 = vmax.f32 %v825_v58, 0.0 }
 0x2c8   :  { %v789_v61 = vpop.f32.mrb[21].mxu1  ;;  %v874_v24 = vmul.f32 %v858_v15, %v782_v55  ;;  %v798_v25 = vadd.f32 %v1184_v59, %v1513_v23  ;;  %v859_v26 = vmin.f32 %v843_v16, 6.0 }
 0x2c9   :  { %908 = vxpose.xlu0.b32.cont [2/16] %v892_v60, 128  ;;  %v1185_v62 = vpop.f32.mrb[22].mxu1  ;;  %v872_v8 = vmul.f32 %v856_v3, %v774_v44  ;;  %v857_v9 = vmin.f32 %v841_v4, 6.0  ;;  %v790_v10 = vadd.f32 %v1513_v23, %v789_v61 }
 0x2ca   :  { %v792_v1 = vpop.f32.mrb[23].mxu1  ;;  %v830_v30 = vadd.f32 3.0, %v798_v25  ;;  %v801_v31 = vadd.f32 %v1185_v62, %v1513_v23  ;;  %v875_v32 = vmul.f32 %v859_v26, %v785_v0  ;;  %v897_v35 = vmul.f32 %v1522_v42, %v874_v24 }
 0x2cb   :  { %v873_v18 = vmul.f32 %v857_v9, %v777_v52  ;;  %v828_v19 = vadd.f32 3.0, %v790_v10  ;;  %v793_v20 = vadd.f32 %v1513_v23, %v792_v1  ;;  %v895_v21 = vmul.f32 %v1522_v42, %v872_v8 }
 0x2cc   :  { %v846_v36 = vmax.f32 %v830_v30, 0.0  ;;  %v831_v37 = vadd.f32 3.0, %v801_v31  ;;  %v898_v41 = vmul.f32 %v1522_v42, %v875_v32 }
 0x2cd   :  { %909 = vxpose.xlu0.b32.cont [3/16] %v893_v5, 128  ;;  %v844_v27 = vmax.f32 %v828_v19, 0.0  ;;  %v829_v28 = vadd.f32 3.0, %v793_v20  ;;  %v896_v29 = vmul.f32 %v1522_v42, %v873_v18 }
 0x2ce   :  { %v862_v43 = vmin.f32 %v846_v36, 6.0  ;;  %v847_v44 = vmax.f32 %v831_v37, 0.0 }
 0x2cf   :  { %v1188_v11 = vpop.f32.mrb[24].mxu1  ;;  %v860_v33 = vmin.f32 %v844_v27, 6.0  ;;  %v845_v34 = vmax.f32 %v829_v28, 0.0 }
 0x2d0   :  { %v805_v13 = vpop.f32.mrb[25].mxu1  ;;  %v863_v49 = vmin.f32 %v847_v44, 6.0  ;;  %v814_v50 = vadd.f32 %v1188_v11, %v1513_v23  ;;  %v878_v51 = vmul.f32 %v862_v43, %v798_v25 }
 0x2d1   :  { %910 = vxpose.xlu0.b32.cont [4/16] %v894_v12, 128  ;;  %v1189_v14 = vpop.f32.mrb[26].mxu1  ;;  %v876_v38 = vmul.f32 %v860_v33, %v790_v10  ;;  %v861_v39 = vmin.f32 %v845_v34, 6.0  ;;  %v806_v40 = vadd.f32 %v1513_v23, %v805_v13 }
 0x2d2   :  { %v808_v17 = vpop.f32.mrb[27].mxu1  ;;  %v879_v55 = vmul.f32 %v863_v49, %v801_v31  ;;  %v834_v56 = vadd.f32 3.0, %v814_v50  ;;  %v817_v58 = vadd.f32 %v1189_v14, %v1513_v23  ;;  %v901_v60 = vmul.f32 %v1522_v42, %v878_v51  ;;  %v964_v49 = vpop.permute.xlu1 %963 }
 0x2d3   :  { %v877_v45 = vmul.f32 %v861_v39, %v793_v20  ;;  %v832_v46 = vadd.f32 3.0, %v806_v40  ;;  %v809_v47 = vadd.f32 %v1513_v23, %v808_v17  ;;  %v899_v48 = vmul.f32 %v1522_v42, %v876_v38 }
 0x2d4   :  { %v850_v61 = vmax.f32 %v834_v56, 0.0  ;;  %v835_v63 = vadd.f32 3.0, %v817_v58  ;;  %v902_v1 = vmul.f32 %v1522_v42, %v879_v55 }
 0x2d5   :  { %911 = vxpose.xlu0.b32.cont [5/16] %v895_v21, 128  ;;  %v848_v52 = vmax.f32 %v832_v46, 0.0  ;;  %v833_v53 = vadd.f32 3.0, %v809_v47  ;;  %v900_v54 = vmul.f32 %v1522_v42, %v877_v45 }
 0x2d6   :  { %v866_v2 = vmin.f32 %v850_v61, 6.0  ;;  %v851_v3 = vmax.f32 %v835_v63, 0.0 }
 0x2d7   :  { %v864_v57 = vmin.f32 %v848_v52, 6.0  ;;  %v849_v59 = vmax.f32 %v833_v53, 0.0 }
 0x2d8   :  { %v882_v6 = vmul.f32 %v866_v2, %v814_v50  ;;  %v867_v7 = vmin.f32 %v851_v3, 6.0 }
 0x2d9   :  { %912 = vxpose.xlu0.b32.cont [6/16] %v896_v29, 128  ;;  %v880_v62 = vmul.f32 %v864_v57, %v806_v40  ;;  %v865_v0 = vmin.f32 %v849_v59, 6.0  ;;  %v966_v40 = vlaneseq }
 0x2da   :  { %v883_v8 = vmul.f32 %v867_v7, %v817_v58  ;;  %v905_v9 = vmul.f32 %v1522_v42, %v882_v6 }
 0x2db   :  { %v881_v4 = vmul.f32 %v865_v0, %v809_v47  ;;  %v903_v5 = vmul.f32 %v1522_v42, %v880_v62  ;;  %v967_v45 = vshrl.u32 %v966_v40, 7 }
 0x2dc   :  { %v906_v10 = vmul.f32 %v1522_v42, %v883_v8 }
 0x2dd   :  { %913 = vxpose.xlu0.b32.cont [7/16] %v897_v35, 128  ;;  %v904_v23 = vmul.f32 %v1522_v42, %v881_v4 }
 0x2e1   :  { %914 = vxpose.xlu0.b32.cont [8/16] %v898_v41, 128 }
 0x2e5   :  { %915 = vxpose.xlu0.b32.cont [9/16] %v899_v48, 128  ;;  %v968_v48 = vsub.s32 0, %v967_v45 }
 0x2e7   :  { %v969_v51 = vrot.slane %v964_v49, %v968_v48 }
 0x2e9   :  { %916 = vxpose.xlu0.b32.cont [10/16] %v900_v54, 128 }
 0x2ed   :  { %917 = vxpose.xlu0.b32.cont [11/16] %v901_v60, 128 }
 0x2f1   :  { %918 = vxpose.xlu0.b32.cont [12/16] %v902_v1, 128 }
 0x2f5   :  { %919 = vxpose.xlu0.b32.cont [13/16] %v903_v5, 128 }
 0x2f9   :  { %920 = vxpose.xlu0.b32.cont [14/16] %v904_v23, 128 }
 0x2fd   :  { %921 = vxpose.xlu0.b32.cont [15/16] %v905_v9, 128 }
 0x301   :  { %922 = vxpose.xlu0.b32.end [16/16] %v906_v10, 128 }
 0x32a   :  { %1225 = vset.pattern.permute.xlu0 %v1284_v22 }
 0x345   :  { %v923_v11 = vpop.trf.xlu0 }
 0x349   :  { %v924_v12 = vpop.trf.xlu0 }
 0x34a   :  { %v939_v20 = vadd.f32 %v924_v12, %v923_v11 }
 0x34d   :  { %v925_v13 = vpop.trf.xlu0 }
 0x34e   :  { %v940_v21 = vadd.f32 %v939_v20, %v925_v13 }
 0x351   :  { %v926_v14 = vpop.trf.xlu0 }
 0x352   :  { %v941_v25 = vadd.f32 %v940_v21, %v926_v14 }
 0x355   :  { %v927_v15 = vpop.trf.xlu0 }
 0x356   :  { %v942_v26 = vadd.f32 %v941_v25, %v927_v15 }
 0x359   :  { %v928_v16 = vpop.trf.xlu0 }
 0x35a   :  { %v943_v28 = vadd.f32 %v942_v26, %v928_v16 }
 0x35d   :  { %v929_v17 = vpop.trf.xlu0 }
 0x35e   :  { %v944_v42 = vadd.f32 %v943_v28, %v929_v17 }
 0x361   :  { %v930_v18 = vpop.trf.xlu0 }
 0x362   :  { %v945_v30 = vadd.f32 %v944_v42, %v930_v18 }
 0x365   :  { %v931_v19 = vpop.trf.xlu0 }
 0x366   :  { %v946_v22 = vadd.f32 %v945_v30, %v931_v19 }
 0x369   :  { %v932_v24 = vpop.trf.xlu0 }
 0x36a   :  { %v947_v32 = vadd.f32 %v946_v22, %v932_v24 }
 0x36d   :  { %v933_v27 = vpop.trf.xlu0 }
 0x36e   :  { %v948_v33 = vadd.f32 %v947_v32, %v933_v27 }
 0x371   :  { %v934_v29 = vpop.trf.xlu0 }
 0x372   :  { %v949_v35 = vadd.f32 %v948_v33, %v934_v29 }
 0x375   :  { %v935_v31 = vpop.trf.xlu0 }
 0x376   :  { %v950_v36 = vadd.f32 %v949_v35, %v935_v31 }
 0x379   :  { %v936_v34 = vpop.trf.xlu0 }
 0x37a   :  { %v951_v38 = vadd.f32 %v950_v36, %v936_v34 }
 0x37d   :  { %v937_v37 = vpop.trf.xlu0 }
 0x37e   :  { %v952_v39 = vadd.f32 %v951_v38, %v937_v37 }
 0x381   :  { %v938_v41 = vpop.trf.xlu0 }
 0x382   :  { %v953_v43 = vadd.f32 %v952_v39, %v938_v41 }
 0x384   :  { %v954_v44 = vrot.slane %v953_v43, 4 }
 0x386   :  { %v955_v46 = vadd.f32 %v954_v44, %v953_v43 }
 0x388   :  { %v956_v47 = vrot.slane %v955_v46, 2 }
 0x38a   :  { %v957_v50 = vadd.f32 %v956_v47, %v955_v46 }
 0x38c   :  { %v958_v52 = vrot.slane %v957_v50, 1 }
 0x38e   :  { %v959_v53 = vadd.f32 %v958_v52, %v957_v50 }
 0x390   :  { %v970_v54 = vadd.f32 %v969_v51, %v959_v53 }
 0x392   :  { %971 = vst [vmem:[#allocation3] sm:$0x1] %v970_v54 }
 0x393   :  { %1271 = shalt.err (!%p1268_p4)
}
 0x394   :  { %s1272_s10 = scalar_lea.hbm %s1576_s11, 16 }
 0x395   :  { %p1273_p5 = scmp.ne.s32.totalorder %s1576_s11, %s1272_s10  ;;  %p1276_p6 = scmp.lt.u32.totalorder %s1272_s10, %s1576_s11 }
 0x397   :  { %p1278_p7 = pnand %p1276_p6, %p1273_p5 }
 0x399   :  { %1281 = shalt.err (!%p1278_p7)
}
 0x39a   :  { %981 = dma.vmem_to_hbm [thread:$0]  %s979_s21, 16, %s1576_s11, [#allocation4]  }
 0x39b   :  { %1282 = dma.done.wait [#allocation4], 16  }
 0x39c   :  { %1283 = vsyncadd [#allocation4], 4294967280 }
 0x39d   :  { %985 = vsyncpa [#allocation4], 1 }

</bundles_post_ra>
